<compile_context>
chip_gen: v5e
topology: v5e:2x2
jax: 0.10.0
libtpu: 0.0.40
codegen_flags: <defaults>
</compile_context>

<pallas_src>
import math

import jax
import jax.numpy as jnp
from jax.experimental import pallas as pl
from jax.experimental.pallas import tpu as pltpu


def _round_up(x, m):
    return (x + m - 1) // m * m


def _mix_py(x):
    """Host-side lowbias32 mixer (pre-mixes the seed once)."""
    x &= 0xFFFFFFFF
    x ^= x >> 16
    x = (x * 0x7FEB352D) & 0xFFFFFFFF
    x ^= x >> 15
    x = (x * 0x846CA68B) & 0xFFFFFFFF
    x ^= x >> 16
    return x


def _mix_u32(x):
    """In-kernel lowbias32 mixer on uint32 vectors (VPU int ops only)."""
    x = x ^ (x >> jnp.uint32(16))
    x = x * jnp.uint32(0x7FEB352D)
    x = x ^ (x >> jnp.uint32(15))
    x = x * jnp.uint32(0x846CA68B)
    x = x ^ (x >> jnp.uint32(16))
    return x


def _bits_to_unit_float(bits):
    """uint32 bits -> float32 uniform in [0, 1) via mantissa bitcast (no int->float convert)."""
    f = jax.lax.bitcast_convert_type(
        (bits >> jnp.uint32(9)) | jnp.uint32(0x3F800000), jnp.float32)
    return f - jnp.float32(1.0)


def _normal_noise(rows, cols, row0_u32, seed_u32):
    """Stateless N(0,1) noise of shape (rows, cols).

    Counter = global (row, col) index hashed with the (pre-mixed) seed. Dual-output
    Box-Muller: one (u1, u2) pair yields two normals, so per output element the cost is
    ~1 integer hash + ~2 transcendentals — keeps the kernel HBM-bound even at v7x bandwidth.
    """
    half = (cols + 1) // 2
    row = jax.lax.broadcasted_iota(jnp.int32, (rows, half), 0).astype(jnp.uint32) + row0_u32
    col = jax.lax.broadcasted_iota(jnp.int32, (rows, half), 1).astype(jnp.uint32)
    base = (row * jnp.uint32(half) + col) * jnp.uint32(2)
    b1 = _mix_u32(base ^ seed_u32)
    b2 = _mix_u32((base + jnp.uint32(1)) ^ seed_u32)
    u1 = jnp.float32(1.0) - _bits_to_unit_float(b1)     # (0, 1]  -> safe for log
    u2 = _bits_to_unit_float(b2)                        # [0, 1)
    r = jnp.sqrt(jnp.float32(-2.0) * jnp.log(u1))
    theta = jnp.float32(2.0 * math.pi) * u2
    z = jnp.concatenate([r * jnp.cos(theta), r * jnp.sin(theta)], axis=-1)
    if 2 * half != cols:
        z = z[:, :cols]
    return z


def _augment_kernel(seed_ref, wav_ref, params_ref, out_ref):
    """One block of rows: apply gain, then add SNR-scaled in-kernel white noise.

    seed_ref   : (1,)    i32  (scalar prefetch, SMEM) — pre-mixed seed bits
    wav_ref    : (R, T)  native dtype
    params_ref : (R, 2)  f32  col0 = gain ratio, col1 = ratio * 10**(-snr_db/20)
    out_ref    : (R, T)  native dtype
    """
    rows, t = wav_ref.shape
    row0 = (pl.program_id(0) * rows).astype(jnp.uint32)
    seed = seed_ref[0].astype(jnp.uint32)

    x = wav_ref[...].astype(jnp.float32)
    n = _normal_noise(rows, t, row0, seed)

    ratio = params_ref[:, 0:1]                      # (R, 1) gain ratio
    snr_fac = params_ref[:, 1:2]                    # (R, 1) ratio * 10**(-snr_db/20)

    es = jnp.sum(x * x, axis=-1, keepdims=True)     # raw-signal energy per row
    en = jnp.sum(n * n, axis=-1, keepdims=True)     # noise energy per row
    en = jnp.maximum(en, jnp.float32(1e-30))        # 0*inf guard (zero-padded rows stay 0)
    scale = snr_fac * jnp.sqrt(es) * jax.lax.rsqrt(en)

    out_ref[...] = (ratio * x + scale * n).astype(out_ref.dtype)


def _vmem_capacity_bytes():
    try:
        return int(pltpu.get_tpu_info().vmem_capacity_bytes)
    except Exception:
        return 64 << 20   # conservative default (v7x per-TensorCore VMEM)


def waveform_augment_pallas(wav, gain_db, snr_db, seed):
    """wav: (B, C, T); gain_db, snr_db: (B,); seed: python int. Returns (B, C, T), same dtype."""
    B, C, T = wav.shape
    BC = B * C
    dtype = wav.dtype
    itemsize = jnp.dtype(dtype).itemsize

    # ---- per-row parameters (tiny (B,)-sized host math) ----
    ratio = 10.0 ** (gain_db.astype(jnp.float32) / 20.0)              # (B,)
    snr_fac = ratio * 10.0 ** (-snr_db.astype(jnp.float32) / 20.0)    # (B,)
    params = jnp.stack([ratio, snr_fac], axis=-1)                     # (B, 2)
    params = jnp.broadcast_to(params[:, None, :], (B, C, 2)).reshape(BC, 2)

    wav2 = wav.reshape(BC, T)   # metadata-only reshape; native dtype, no T padding

    # ---- generation-aware VMEM budget & row-block sizing ----
    vmem_cap = _vmem_capacity_bytes()
    vmem_limit = min(vmem_cap // 2, 64 << 20)     # 64 MiB on v5e/v6e, 32 MiB on v7x
    budget = (vmem_limit * 3) // 4
    # per row: wav + out double-buffered + ~7 f32 temporaries (noise, bits, u1/u2, trig)
    bytes_per_row = T * (4 * itemsize + 28) + 64
    # TODO(synk): for very long T where even 8 rows exceed the budget, split into an
    # energy pass + apply pass over T chunks (2-D grid) instead of one (rblk, T) block.
    rmax = max(8, (budget // bytes_per_row) // 8 * 8)
    # keep >= ~4 grid steps so the DMA pipeline overlaps and 2-TC chips can shard the grid
    min_steps = 4
    if BC >= min_steps * 8:
        rmax = min(rmax, max(8, (BC // min_steps) // 8 * 8))

    if BC % 8 == 0:
        # pick the largest multiple of 8 that divides BC (no row padding, no extra HBM pass)
        rblk = 8
        r = min(rmax, BC)
        while r >= 8:
            if BC % r == 0:
                rblk = r
                break
            r -= 8
        BC_pad = BC
    else:
        # TODO(synk): handle the ragged row tail in-kernel (masked store) instead of padding.
        rblk = min(rmax, _round_up(BC, 8))
        BC_pad = _round_up(BC, rblk)
        wav2 = jnp.pad(wav2, ((0, BC_pad - BC), (0, 0)))
        params = jnp.pad(params, ((0, BC_pad - BC), (0, 0)))

    seed_mixed = _mix_py(int(seed))
    if seed_mixed >= (1 << 31):
        seed_mixed -= 1 << 32
    seed_arr = jnp.asarray([seed_mixed], dtype=jnp.int32)

    grid = (BC_pad // rblk,)

    out2 = pl.pallas_call(
        _augment_kernel,
        out_shape=jax.ShapeDtypeStruct((BC_pad, T), dtype),
        grid_spec=pltpu.PrefetchScalarGridSpec(
            num_scalar_prefetch=1,
            grid=grid,
            in_specs=[
                pl.BlockSpec((rblk, T), lambda i, s: (i, 0)),
                pl.BlockSpec((rblk, 2), lambda i, s: (i, 0)),
            ],
            out_specs=pl.BlockSpec((rblk, T), lambda i, s: (i, 0)),
        ),
        compiler_params=pltpu.CompilerParams(
            dimension_semantics=("parallel",),
            vmem_limit_bytes=vmem_limit,
        ),
    )(seed_arr, wav2, params)

    if BC_pad != BC:
        out2 = out2[:BC]
    return out2.reshape(B, C, T)


def waveform_augment(wav, key, *, white_noise_range=(5.0, 20.0), gain_db_range=(-6.0, 6.0),
                     seed=0):
    """Full module: sample gain_db / snr_db like the PyTorch module, then run the kernel."""
    B = wav.shape[0]
    k_gain, k_snr = jax.random.split(key, 2)
    min_g, max_g = gain_db_range
    min_s, max_s = white_noise_range
    gain_db = jax.random.uniform(k_gain, (B,), dtype=jnp.float32) * (max_g - min_g) + min_g
    snr_db = jax.random.uniform(k_snr, (B,), dtype=jnp.float32) * (max_s - min_s) + min_s
    return waveform_augment_pallas(wav, gain_db, snr_db, seed)


if __name__ == "__main__":
    # WaveformAugment(white_noise_range=(5, 20), gain_db_range=(-6, 6))
    min_snr, max_snr = 5.0, 20.0
    min_gain, max_gain = -6.0, 6.0

    B, C, T = 2, 4, 16
    key = jax.random.PRNGKey(0)
    k_wav, k_gain, k_snr, _ = jax.random.split(key, 4)

    wav = jax.random.normal(k_wav, (B, C, T), dtype=jnp.float32)
    gain_db = jax.random.uniform(k_gain, (B,), dtype=jnp.float32) * (max_gain - min_gain) + min_gain
    snr_db = jax.random.uniform(k_snr, (B,), dtype=jnp.float32) * (max_snr - min_snr) + min_snr
    seed = 1234

    out = waveform_augment_pallas(wav, gain_db, snr_db, seed)
    out = jax.block_until_ready(out)
    assert out.shape == (B, C, T)
    assert out.dtype == wav.dtype
    assert bool(jnp.all(jnp.isfinite(out)))

    # Semantic check (noise is drawn in-kernel, so no element-wise reference):
    # decompose out = gained + scaled_noise; the achieved per-(b,c) SNR must equal snr_db.
    ratio = 10.0 ** (gain_db / 20.0)
    gained = ratio[:, None, None] * wav
    noise_part = out - gained
    es = jnp.sum(gained * gained, axis=-1)
    en = jnp.sum(noise_part * noise_part, axis=-1)
    achieved_snr = 10.0 * (jnp.log10(es) - jnp.log10(en))          # (B, C)
    assert jnp.allclose(achieved_snr, snr_db[:, None], atol=5e-2), (achieved_snr, snr_db)

    # Gain check: at a very high SNR the noise term is negligible -> out ≈ ratio * wav.
    out_hi = waveform_augment_pallas(wav, gain_db, jnp.full((B,), 200.0, jnp.float32), seed)
    out_hi = jax.block_until_ready(out_hi)
    assert jnp.allclose(out_hi, gained, atol=1e-4, rtol=1e-4)

    print("KERNEL_OK")
</pallas_src>

<mosaic_0001>
module attributes {stable_mosaic.version = 11 : i64} {
  func.func @_augment_kernel(%arg0: i32, %arg1: memref<1xi32, #tpu.memory_space<smem>>, %arg2: memref<8x16xf32, #tpu.memory_space<vmem>>, %arg3: memref<8x2xf32, #tpu.memory_space<vmem>>, %arg4: memref<8x16xf32, #tpu.memory_space<vmem>>) attributes {dimension_semantics = [#tpu.dimension_semantics<parallel>], iteration_bounds = array<i64: 1>, scalar_prefetch = 1 : i64, scratch_operands = 0 : i64, tpu.core_type = #tpu.core_type<tc>, window_params = [{transform_indices = @transform_0, window_bounds = array<i64: 8, 16>}, {transform_indices = @transform_1, window_bounds = array<i64: 8, 2>}, {transform_indices = @transform_2, window_bounds = array<i64: 8, 16>}]} {
    %c8_i32 = arith.constant 8 : i32
    %0 = arith.muli %arg0, %c8_i32 : i32
    %c0 = arith.constant 0 : index
    %1 = memref.load %arg1[%c0] : memref<1xi32, #tpu.memory_space<smem>>
    %c0_0 = arith.constant 0 : index
    %c0_1 = arith.constant 0 : index
    %2 = vector.load %arg2[%c0_0, %c0_1] : memref<8x16xf32, #tpu.memory_space<vmem>>, vector<8x16xf32>
    %3 = tpu.iota {dimensions = array<i32: 0>} : vector<8x8xi32>
    %4 = vector.broadcast %0 : i32 to vector<8x8xi32>
    %5 = arith.addi %3, %4 : vector<8x8xi32>
    %6 = tpu.iota {dimensions = array<i32: 1>} : vector<8x8xi32>
    %c8_i32_2 = arith.constant 8 : i32
    %7 = vector.broadcast %c8_i32_2 : i32 to vector<8x8xi32>
    %8 = arith.muli %5, %7 : vector<8x8xi32>
    %9 = arith.addi %8, %6 : vector<8x8xi32>
    %c2_i32 = arith.constant 2 : i32
    %10 = vector.broadcast %c2_i32 : i32 to vector<8x8xi32>
    %11 = arith.muli %9, %10 : vector<8x8xi32>
    %12 = vector.broadcast %1 : i32 to vector<8x8xi32>
    %13 = arith.xori %11, %12 : vector<8x8xi32>
    %c16_i32 = arith.constant 16 : i32
    %14 = vector.broadcast %c16_i32 : i32 to vector<8x8xi32>
    %15 = arith.shrui %13, %14 : vector<8x8xi32>
    %16 = arith.xori %13, %15 : vector<8x8xi32>
    %c2146121005_i32 = arith.constant 2146121005 : i32
    %17 = vector.broadcast %c2146121005_i32 : i32 to vector<8x8xi32>
    %18 = arith.muli %16, %17 : vector<8x8xi32>
    %c15_i32 = arith.constant 15 : i32
    %19 = vector.broadcast %c15_i32 : i32 to vector<8x8xi32>
    %20 = arith.shrui %18, %19 : vector<8x8xi32>
    %21 = arith.xori %18, %20 : vector<8x8xi32>
    %c-2073254261_i32 = arith.constant -2073254261 : i32
    %22 = vector.broadcast %c-2073254261_i32 : i32 to vector<8x8xi32>
    %23 = arith.muli %21, %22 : vector<8x8xi32>
    %c16_i32_3 = arith.constant 16 : i32
    %24 = vector.broadcast %c16_i32_3 : i32 to vector<8x8xi32>
    %25 = arith.shrui %23, %24 : vector<8x8xi32>
    %26 = arith.xori %23, %25 : vector<8x8xi32>
    %c1_i32 = arith.constant 1 : i32
    %27 = vector.broadcast %c1_i32 : i32 to vector<8x8xi32>
    %28 = arith.addi %11, %27 : vector<8x8xi32>
    %29 = vector.broadcast %1 : i32 to vector<8x8xi32>
    %30 = arith.xori %28, %29 : vector<8x8xi32>
    %c16_i32_4 = arith.constant 16 : i32
    %31 = vector.broadcast %c16_i32_4 : i32 to vector<8x8xi32>
    %32 = arith.shrui %30, %31 : vector<8x8xi32>
    %33 = arith.xori %30, %32 : vector<8x8xi32>
    %c2146121005_i32_5 = arith.constant 2146121005 : i32
    %34 = vector.broadcast %c2146121005_i32_5 : i32 to vector<8x8xi32>
    %35 = arith.muli %33, %34 : vector<8x8xi32>
    %c15_i32_6 = arith.constant 15 : i32
    %36 = vector.broadcast %c15_i32_6 : i32 to vector<8x8xi32>
    %37 = arith.shrui %35, %36 : vector<8x8xi32>
    %38 = arith.xori %35, %37 : vector<8x8xi32>
    %c-2073254261_i32_7 = arith.constant -2073254261 : i32
    %39 = vector.broadcast %c-2073254261_i32_7 : i32 to vector<8x8xi32>
    %40 = arith.muli %38, %39 : vector<8x8xi32>
    %c16_i32_8 = arith.constant 16 : i32
    %41 = vector.broadcast %c16_i32_8 : i32 to vector<8x8xi32>
    %42 = arith.shrui %40, %41 : vector<8x8xi32>
    %43 = arith.xori %40, %42 : vector<8x8xi32>
    %c9_i32 = arith.constant 9 : i32
    %44 = vector.broadcast %c9_i32 : i32 to vector<8x8xi32>
    %45 = arith.shrui %26, %44 : vector<8x8xi32>
    %c1065353216_i32 = arith.constant 1065353216 : i32
    %46 = vector.broadcast %c1065353216_i32 : i32 to vector<8x8xi32>
    %47 = arith.ori %45, %46 : vector<8x8xi32>
    %48 = tpu.bitcast %47 : vector<8x8xi32> -> vector<8x8xf32>
    %cst = arith.constant 1.000000e+00 : f32
    %49 = vector.broadcast %cst : f32 to vector<8x8xf32>
    %50 = arith.subf %48, %49 : vector<8x8xf32>
    %cst_9 = arith.constant 1.000000e+00 : f32
    %51 = vector.broadcast %cst_9 : f32 to vector<8x8xf32>
    %52 = arith.subf %51, %50 : vector<8x8xf32>
    %c9_i32_10 = arith.constant 9 : i32
    %53 = vector.broadcast %c9_i32_10 : i32 to vector<8x8xi32>
    %54 = arith.shrui %43, %53 : vector<8x8xi32>
    %c1065353216_i32_11 = arith.constant 1065353216 : i32
    %55 = vector.broadcast %c1065353216_i32_11 : i32 to vector<8x8xi32>
    %56 = arith.ori %54, %55 : vector<8x8xi32>
    %57 = tpu.bitcast %56 : vector<8x8xi32> -> vector<8x8xf32>
    %cst_12 = arith.constant 1.000000e+00 : f32
    %58 = vector.broadcast %cst_12 : f32 to vector<8x8xf32>
    %59 = arith.subf %57, %58 : vector<8x8xf32>
    %60 = math.log %52 : vector<8x8xf32>
    %cst_13 = arith.constant -2.000000e+00 : f32
    %61 = vector.broadcast %cst_13 : f32 to vector<8x8xf32>
    %62 = arith.mulf %61, %60 : vector<8x8xf32>
    %63 = math.sqrt %62 : vector<8x8xf32>
    %cst_14 = arith.constant 6.28318548 : f32
    %64 = vector.broadcast %cst_14 : f32 to vector<8x8xf32>
    %65 = arith.mulf %64, %59 : vector<8x8xf32>
    %66 = math.cos %65 : vector<8x8xf32>
    %67 = arith.mulf %63, %66 : vector<8x8xf32>
    %68 = math.sin %65 : vector<8x8xf32>
    %69 = arith.mulf %63, %68 : vector<8x8xf32>
    %70 = tpu.concatenate %67, %69 in 1 : vector<8x8xf32>, vector<8x8xf32> -> vector<8x16xf32>
    %c0_15 = arith.constant 0 : index
    %c0_16 = arith.constant 0 : index
    %71 = vector.load %arg3[%c0_15, %c0_16] : memref<8x2xf32, #tpu.memory_space<vmem>>, vector<8x1xf32>
    %c0_17 = arith.constant 0 : index
    %c1 = arith.constant 1 : index
    %72 = vector.load %arg3[%c0_17, %c1] : memref<8x2xf32, #tpu.memory_space<vmem>>, vector<8x1xf32>
    %73 = arith.mulf %2, %2 : vector<8x16xf32>
    %cst_18 = arith.constant dense<0.000000e+00> : vector<8xf32>
    %74 = vector.multi_reduction <add>, %73, %cst_18 [1] : vector<8x16xf32> to vector<8xf32>
    %75 = vector.shape_cast %74 : vector<8xf32> to vector<8x1xf32>
    %76 = arith.mulf %70, %70 : vector<8x16xf32>
    %cst_19 = arith.constant dense<0.000000e+00> : vector<8xf32>
    %77 = vector.multi_reduction <add>, %76, %cst_19 [1] : vector<8x16xf32> to vector<8xf32>
    %78 = vector.shape_cast %77 : vector<8xf32> to vector<8x1xf32>
    %cst_20 = arith.constant 1.000000e-30 : f32
    %79 = vector.broadcast %cst_20 : f32 to vector<8x1xf32>
    %80 = arith.maximumf %78, %79 : vector<8x1xf32>
    %81 = math.sqrt %75 : vector<8x1xf32>
    %82 = arith.mulf %72, %81 : vector<8x1xf32>
    %83 = math.rsqrt %80 : vector<8x1xf32>
    %84 = arith.mulf %82, %83 : vector<8x1xf32>
    %85 = vector.broadcast %71 : vector<8x1xf32> to vector<8x16xf32>
    %86 = arith.mulf %85, %2 : vector<8x16xf32>
    %87 = vector.broadcast %84 : vector<8x1xf32> to vector<8x16xf32>
    %88 = arith.mulf %87, %70 : vector<8x16xf32>
    %89 = arith.addf %86, %88 : vector<8x16xf32>
    %c0_21 = arith.constant 0 : index
    %c0_22 = arith.constant 0 : index
    %90 = vector.load %arg4[%c0_21, %c0_22] : memref<8x16xf32, #tpu.memory_space<vmem>>, vector<8x16xf32>
    tpu.vector_store %arg4[%c0_21, %c0_22], %89 {strides = array<i32>} : memref<8x16xf32, #tpu.memory_space<vmem>>, vector<8x16xf32>,
    return
  }
  func.func @transform_0(%arg0: i32, %arg1: memref<1xi32, #tpu.memory_space<smem>>) -> (i32, i32) {
    %c0_i32 = arith.constant 0 : i32
    %c0_i32_0 = arith.constant 0 : i32
    return %arg0, %c0_i32 : i32, i32
  }
  func.func @transform_1(%arg0: i32, %arg1: memref<1xi32, #tpu.memory_space<smem>>) -> (i32, i32) {
    %c0_i32 = arith.constant 0 : i32
    %c0_i32_0 = arith.constant 0 : i32
    return %arg0, %c0_i32 : i32, i32
  }
  func.func @transform_2(%arg0: i32, %arg1: memref<1xi32, #tpu.memory_space<smem>>) -> (i32, i32) {
    %c0_i32 = arith.constant 0 : i32
    %c0_i32_0 = arith.constant 0 : i32
    return %arg0, %c0_i32 : i32, i32
  }
}

</mosaic_0001>

<bundles_post_ra>
// kernel: tpu_custom_call.1
= control target key start
LH: loop header
LB: loop body
LE: loop exit
PB: predicated region body
PF: predicated region fallthrough
CT: control target
= control target key end

     0   :  { %v17_v0 = vlaneseq  ;;  %s613_s0 = inlined_call_operand.<no memory space> [shape: s32[1], index: 0, kind: input, shape index: {}]   ;;  %s614_s1 = inlined_call_operand.vmem [shape: f32[8,16], index: 1, kind: input, shape index: {}]   ;;  %s615_s2 = inlined_call_operand.vmem [shape: f32[8,2], index: 2, kind: input, shape index: {}]   ;;  %s616_s3 = inlined_call_operand.hbm [shape: f32[8,16], index: 3, kind: output, shape index: {}]  }
   0x1   :  { %9 = vsyncpa [#allocation5], 0  ;;  %v26_v6 = vstv %s613_s0  ;;  %v508_v24 = vmov 0   ;;  %v509_v40 = vmov 683565275   ;;  %s515_s0 = smov 8  }
   0x2   :  { %v18_v1 = vshrl.u32 %v17_v0, 7  ;;  %v22_v2 = vand.u32 127, %v17_v0  ;;  %471 = vset.pattern.permute.xlu1 %v508_v24  ;;  %v510_v42 = vmov 2475754826   ;;  %v511_v44 = vmov 2131351028  }
   0x3   :  { %v512_v46 = vmov 2102212464   ;;  %v513_v48 = vmov 920167782   ;;  %v514_v55 = vmov 1326507024  }
   0x4   :  { %v23_v3 = vmul.u32 8, %v18_v1  ;;  %s444_s20 = sshll.u32 %s616_s3, 4  ;;  %s445_s20 = int_to_ptr.hbm [resolvable:$true] %s444_s20 }
   0x6   :  { %v24_v4 = vadd.s32 %v23_v3, %v22_v2 }
   0x8   :  { %v25_v5 = vmul.u32 2, %v24_v4 }
   0xa   :  { %v27_v7 = vxor.u32 %v26_v6, %v25_v5  ;;  %v36_v8 = vadd.s32 1, %v25_v5 }
   0xc   :  { %v37_v9 = vxor.u32 %v36_v8, %v26_v6  ;;  %v28_v18 = vshrl.u32 %v27_v7, 16 }
   0xe   :  { %v38_v10 = vshrl.u32 %v37_v9, 16  ;;  %v29_v21 = vxor.u32 %v28_v18, %v27_v7 }
  0x10   :  { %v39_v11 = vxor.u32 %v38_v10, %v37_v9  ;;  %v30_v25 = vmul.u32 2146121005, %v29_v21 }
  0x12   :  { %v40_v12 = vmul.u32 2146121005, %v39_v11  ;;  %v31_v28 = vshrl.u32 %v30_v25, 15 }
  0x14   :  { %v41_v13 = vshrl.u32 %v40_v12, 15  ;;  %v32_v32 = vxor.u32 %v31_v28, %v30_v25 }
  0x16   :  { %v42_v14 = vxor.u32 %v41_v13, %v40_v12  ;;  %v33_v35 = vmul.u32 2221713035, %v32_v32 }
  0x18   :  { %v43_v15 = vmul.u32 2221713035, %v42_v14  ;;  %v34_v50 = vshrl.u32 %v33_v35, 16 }
  0x1a   :  { %v44_v16 = vshrl.u32 %v43_v15, 16  ;;  %v35_v1 = vxor.u32 %v34_v50, %v33_v35 }
  0x1c   :  { %v45_v17 = vxor.u32 %v44_v16, %v43_v15  ;;  %v46_v14 = vshrl.u32 %v35_v1, 9 }
  0x1e   :  { %v51_v19 = vshrl.u32 %v45_v17, 9 }
  0x20   :  { %v52_v20 = vor.u32 1065353216, %v51_v19 }
  0x22   :  { %v454_v22 = vadd.f32 -1.0, %v52_v20 }
  0x24   :  { %v541_v23 = vmul.f32 6.2831855, %v454_v22 }
  0x26   :  { %v74_v26 = vand.u32 2139095040, %v541_v23  ;;  %v71_v29 = vand.u32 2147483647, %v541_v23  ;;  %vm73_vm12 = vcmp.lt.s32.totalorder %v541_v23, 0 }
  0x28   :  { %v75_v27 = vshrl.u32 %v74_v26, 23  ;;  %v78_v33 = vand.u32 8388607, %v71_v29  ;;  %vm72_vm13 = vcmp.le.f32.partialorder %v71_v29, 0.7853982 }
  0x2a   :  { %v455_v30 = vadd.s32 4294967169, %v75_v27  ;;  %v79_v37 = vor.u32 8388608, %v78_v33  ;;  %v47_v27 = vor.u32 1065353216, %v46_v14 }
  0x2c   :  { %v81_v31 = vadd.s32 1, %v455_v30  ;;  %v551_v57 = vshll.u32 %v79_v37, 8  ;;  %v453_v50 = vadd.f32 -1.0, %v47_v27 }
  0x2e   :  { %vm82_vm0 = vcmp.gt.s32.totalorder %v81_v31, 0  ;;  %v120_v6 = vand.u32 65535, %v551_v57  ;;  %v121_v7 = vshrl.u32 %v551_v57, 16 }
  0x2f   :  { %v83_v34 = vsel %vm82_vm0, %v81_v31, 0 }
  0x30   :  { %v85_v36 = vand.u32 31, %v83_v34  ;;  %v548_v38 = vshrl.u32 %v83_v34, 5 }
  0x32   :  { %v86_v39 = vsub.s32 32, %v85_v36  ;;  %v88_v41 = vshll.u32 %v509_v40, %v85_v36  ;;  %v91_v43 = vshll.u32 %v510_v42, %v85_v36  ;;  %v94_v45 = vshll.u32 %v511_v44, %v85_v36 }
  0x33   :  { %v97_v47 = vshll.u32 %v512_v46, %v85_v36  ;;  %v100_v49 = vshll.u32 %v513_v48, %v85_v36  ;;  %vm103_vm1 = vcmp.lt.s32.totalorder %v548_v38, 1  ;;  %vm106_vm2 = vcmp.lt.s32.totalorder %v548_v38, 4 }
  0x34   :  { %v89_v51 = vshrl.u32 %v510_v42, %v86_v39  ;;  %v92_v52 = vshrl.u32 %v511_v44, %v86_v39  ;;  %v95_v53 = vshrl.u32 %v512_v46, %v86_v39  ;;  %v98_v54 = vshrl.u32 %v513_v48, %v86_v39 }
  0x35   :  { %v101_v56 = vshrl.u32 %v514_v55, %v86_v39  ;;  %vm105_vm3 = vcmp.lt.s32.totalorder %v548_v38, 3  ;;  %vm104_vm4 = vcmp.lt.s32.totalorder %v548_v38, 2  ;;  %v87_v15 = vshrl.u32 %v509_v40, %v86_v39 }
  0x36   :  { %v90_v58 = vor.u32 %v89_v51, %v88_v41  ;;  %v93_v59 = vor.u32 %v92_v52, %v91_v43  ;;  %v96_v60 = vor.u32 %v95_v53, %v94_v45  ;;  %v99_v61 = vor.u32 %v98_v54, %v97_v47 }
  0x37   :  { %v102_v62 = vor.u32 %v101_v56, %v100_v49 }
  0x38   :  { %v111_v63 = vsel %vm103_vm1, %v90_v58, %v93_v59  ;;  %v115_v0 = vsel %vm103_vm1, %v93_v59, %v96_v60  ;;  %v112_v2 = vsel %vm106_vm2, %v99_v61, 920167782  ;;  %v107_v31 = vsel %vm103_vm1, %v87_v15, %v90_v58 }
  0x39   :  { %v116_v3 = vsel %vm106_vm2, %v102_v62, 1326507024  ;;  %v113_v4 = vsel %vm105_vm3, %v96_v60, %v112_v2  ;;  %v108_v34 = vsel %vm106_vm2, %v96_v60, 2102212464  ;;  %v50_v58 = vsub.f32 1.0, %v453_v50 }
  0x3a   :  { %v117_v5 = vsel %vm105_vm3, %v99_v61, %v116_v3  ;;  %v114_v8 = vsel %vm104_vm4, %v111_v63, %v113_v4  ;;  %v109_v44 = vsel %vm105_vm3, %v93_v59, %v108_v34 }
  0x3b   :  { %v118_v9 = vsel %vm104_vm4, %v115_v0, %v117_v5  ;;  %v144_v12 = vand.u32 65535, %v114_v8  ;;  %v145_v13 = vshrl.u32 %v114_v8, 16  ;;  %v110_v53 = vsel %vm104_vm4, %v107_v31, %v109_v44 }
  0x3c   :  { %v122_v10 = vand.u32 65535, %v118_v9  ;;  %v123_v11 = vshrl.u32 %v118_v9, 16  ;;  %v164_v60 = vmul.u32 %v551_v57, %v110_v53  ;;  %474 = vlog2.f32 %v50_v58 }
  0x3d   :  { %v146_v19 = vmul.u32 %v144_v12, %v120_v6  ;;  %v147_v20 = vmul.u32 %v145_v13, %v120_v6  ;;  %v148_v21 = vmul.u32 %v144_v12, %v121_v7  ;;  %v149_v28 = vmul.u32 %v145_v13, %v121_v7 }
  0x3e   :  { %v124_v16 = vmul.u32 %v122_v10, %v120_v6  ;;  %v125_v17 = vmul.u32 %v123_v11, %v120_v6  ;;  %v126_v18 = vmul.u32 %v122_v10, %v121_v7  ;;  %v127_v22 = vmul.u32 %v123_v11, %v121_v7 }
  0x3f   :  { %v150_v30 = vshll.u32 %v147_v20, 16  ;;  %v152_v33 = vshll.u32 %v148_v21, 16  ;;  %v151_v42 = vshrl.u32 %v147_v20, 16  ;;  %v153_v48 = vshrl.u32 %v148_v21, 16 }
  0x40   :  { %v128_v25 = vshll.u32 %v125_v17, 16  ;;  %v130_v26 = vshll.u32 %v126_v18, 16  ;;  %v129_v37 = vshrl.u32 %v125_v17, 16  ;;  %v131_v45 = vshrl.u32 %v126_v18, 16 }
  0x41   :  { %vm154_vm6 = vc.u32 %v146_v19, %v150_v30  ;;  %v156_v36 = vadd.s32 %v150_v30, %v146_v19 }
  0x42   :  { %vm132_vm5 = vc.u32 %v124_v16, %v128_v25  ;;  %v134_v32 = vadd.s32 %v128_v25, %v124_v16  ;;  %v155_v40 = vsel %vm154_vm6, 1, %v508_v24  ;;  %v475_v0 = vpop.eup %474  ;;  %vm214_vm6 = vweird.f32 %v541_v23 }
  0x43   :  { %v133_v35 = vsel %vm132_vm5, 1, %v508_v24  ;;  %v157_v43 = vadd.s32 %v155_v40, %v149_v28  ;;  %vm158_vm8 = vc.u32 %v156_v36, %v152_v33  ;;  %v160_v52 = vadd.s32 %v156_v36, %v152_v33 }
  0x44   :  { %v135_v39 = vadd.s32 %v133_v35, %v127_v22  ;;  %vm136_vm7 = vc.u32 %v134_v32, %v130_v26  ;;  %v159_v47 = vsel %vm158_vm8, 1, %v508_v24  ;;  %v56_v3 = vmul.f32 0.6931472, %v475_v0 }
  0x45   :  { %v137_v41 = vsel %vm136_vm7, 1, %v508_v24  ;;  %v161_v49 = vadd.s32 %v159_v47, %v157_v43  ;;  %vm390_vm7 = vcmask 130048   ;;  %vm386_vm8 = vcmask 64512  }
  0x46   :  { %v139_v46 = vadd.s32 %v137_v41, %v135_v39  ;;  %v587_v5 = vmul.f32 -2.0, %v56_v3 }
  0x47   :  { %v162_v54 = vadd.s32 %v161_v49, %v151_v42 }
  0x48   :  { %v140_v51 = vadd.s32 %v139_v46, %v129_v37  ;;  %476 = vrsqrt.f32 %v587_v5  ;;  %vm65_vm14 = vcmp.eq.f32.partialorder %v587_v5, inf  ;;  %vm67_vm1 = vcmp.eq.f32.partialorder %v587_v5, 0.0 }
  0x49   :  { %v163_v56 = vadd.s32 %v162_v54, %v153_v48 }
  0x4a   :  { %v141_v55 = vadd.s32 %v140_v51, %v131_v45 }
  0x4b   :  { %v167_v59 = vadd.s32 1, %v163_v56 }
  0x4c   :  { %vm166_vm9 = vc.u32 %v141_v55, %v160_v52  ;;  %v165_v57 = vadd.s32 %v160_v52, %v141_v55  ;;  %v68_v52 = vand.u32 2147483648, %v587_v5 }
  0x4d   :  { %v168_v61 = vsel %vm166_vm9, %v167_v59, %v163_v56 }
  0x4e   :  { %v169_v62 = vadd.s32 %v168_v61, %v164_v60  ;;  %v477_v14 = vpop.eup %476 }
  0x4f   :  { %v59_v19 = vmul.f32 %v477_v14, %v587_v5 }
  0x50   :  { %v170_v24 = vadd.s32 536870912, %v169_v62 }
  0x51   :  { %v60_v22 = vmul.f32 %v477_v14, %v59_v19 }
  0x52   :  { %v171_v63 = vshrl.u32 %v170_v24, 30 }
  0x53   :  { %v61_v28 = vmul.f32 0.5, %v60_v22 }
  0x54   :  { %v172_v1 = vshll.u32 %v171_v63, 30  ;;  %v195_v25 = vsub.s32 4, %v171_v63 }
  0x55   :  { %v62_v36 = vsub.f32 1.5, %v61_v28 }
  0x56   :  { %v173_v2 = vsub.s32 %v169_v62, %v172_v1  ;;  %v196_v30 = vsel %vm73_vm12, %v195_v25, %v171_v63 }
  0x57   :  { %v198_v33 = vsel %vm72_vm13, 0, %v196_v30  ;;  %v63_v43 = vmul.f32 %v477_v14, %v62_v36 }
  0x58   :  { %vm174_vm10 = vcmp.lt.s32.totalorder %v173_v2, 0  ;;  %v175_v38 = vsub.s32 0, %v173_v2  ;;  %v370_v40 = vadd.s32 3, %v198_v33  ;;  %v215_v29 = vand.u32 3, %v198_v33 }
  0x59   :  { %v64_v49 = vmul.f32 %v63_v43, %v587_v5 }
  0x5a   :  { %v176_v4 = vsel %vm174_vm10, %v175_v38, %v173_v2  ;;  %v371_v46 = vand.u32 3, %v370_v40  ;;  %vm220_vm15 = vcmp.eq.s32.totalorder %v215_v29, 2  ;;  %vm216_vm2 = vcmp.lt.s32.totalorder %v215_v29, 2  ;;  %v16_v38 = vld [vmem:[%s614_s1] sm:$0xff]  ;;  %s517_s1 = smov [#allocation4]  }
  0x5b   :  { %v177_v6 = vclz %v176_v4  ;;  %v66_v55 = vsel %vm65_vm14, %v587_v5, %v64_v49  ;;  %vm217_vm3 = vcmp.eq.s32.totalorder %v215_v29, 0  ;;  %v389_v4 = vmul.f32 %v16_v38, %v16_v38 }
  0x5c   :  { %vm376_vm0 = vcmp.eq.s32.totalorder %v371_v46, 2  ;;  %vm373_vm4 = vcmp.eq.s32.totalorder %v371_v46, 0  ;;  %vm372_vm5 = vcmp.lt.s32.totalorder %v371_v46, 2  ;;  %v69_v59 = vsel %vm67_vm1, %v68_v52, %v66_v55 }
  0x5d   :  { %v456_v7 = vadd.s32 4294967294, %v177_v6  ;;  %v391_v5 = vsel %vm390_vm7, %v389_v4, 0.0 }
  0x5f   :  { %vm457_vm11 = vcmp.lt.s32.totalorder %v456_v7, 0 }
  0x60   :  { %v180_v8 = vsel %vm457_vm11, 0, %v456_v7 }
  0x61   :  { %v181_v9 = vsub.s32 32, %v180_v8  ;;  %v182_v10 = vshll.u32 %v173_v2, %v180_v8  ;;  %v185_v11 = vsub.s32 4294967266, %v180_v8  ;;  %v388_v8 = vld [vmem:[%s615_s2] sm:$0xff]  ;;  %s442_s2 = sshll.u32 %s517_s1, 4  ;;  %s443_s2 = int_to_ptr.vmem [resolvable:$true] %s442_s2 }
  0x63   :  { %v183_v12 = vshrl.u32 %v165_v57, %v181_v9  ;;  %v186_v13 = vadd.s32 127, %v185_v11 }
  0x65   :  { %v184_v15 = vor.u32 %v183_v12, %v182_v10  ;;  %v187_v16 = vshll.u32 %v186_v13, 23  ;;  %v516_v10 = vmov 1  }
  0x66   :  { %472 = vset.pattern.permute.xlu2 %v516_v10  ;;  %473 = vset.pattern.permute.xlu0 %v516_v10 }
  0x67   :  { %v188_v17 = vor.u32 4788187, %v187_v16  ;;  %v191_v18 = vcvt.s32.f32 %v184_v15 }
  0x69   :  { %v189_v20 = vand.u32 2147483647, %v188_v17 }
  0x6b   :  { %v192_v21 = vmul.f32 %v191_v18, %v189_v20 }
  0x6d   :  { %v193_v26 = vxor.u32 2147483648, %v192_v21 }
  0x6f   :  { %v194_v27 = vsel %vm73_vm12, %v193_v26, %v192_v21 }
  0x70   :  { %v197_v31 = vsel %vm72_vm13, %v541_v23, %v194_v27 }
  0x71   :  { %v199_v32 = vmul.f32 %v197_v31, %v197_v31 }
  0x73   :  { %v200_v34 = vmul.f32 -0.001358992, %v199_v32  ;;  %v207_v35 = vmul.f32 -0.00019511016, %v199_v32 }
  0x75   :  { %v201_v37 = vadd.f32 0.041655596, %v200_v34  ;;  %v208_v39 = vadd.f32 0.008332121, %v207_v35 }
  0x77   :  { %v202_v41 = vmul.f32 %v201_v37, %v199_v32  ;;  %v209_v42 = vmul.f32 %v208_v39, %v199_v32 }
  0x79   :  { %v203_v44 = vadd.f32 -0.4999988, %v202_v41  ;;  %v210_v45 = vadd.f32 -0.16666654, %v209_v42 }
  0x7b   :  { %v204_v47 = vmul.f32 %v203_v44, %v199_v32  ;;  %v211_v48 = vmul.f32 %v210_v45, %v199_v32 }
  0x7d   :  { %v205_v50 = vadd.f32 1.0, %v204_v47  ;;  %v212_v51 = vadd.f32 1.0, %v211_v48 }
  0x7f   :  { %v213_v53 = vmul.f32 %v212_v51, %v197_v31  ;;  %v221_v54 = vxor.u32 2147483648, %v205_v50 }
  0x81   :  { %v218_v56 = vxor.u32 2147483648, %v213_v53  ;;  %v222_v58 = vsel %vm220_vm15, %v221_v54, %v213_v53  ;;  %v378_v60 = vsel %vm376_vm0, %v221_v54, %v213_v53 }
  0x83   :  { %v219_v61 = vsel %vm217_vm3, %v205_v50, %v218_v56  ;;  %v375_v62 = vsel %vm373_vm4, %v205_v50, %v218_v56 }
  0x84   :  { %v223_v24 = vsel %vm216_vm2, %v219_v61, %v222_v58  ;;  %v379_v63 = vsel %vm372_vm5, %v375_v62, %v378_v60 }
  0x85   :  { %v224_v0 = vsel %vm214_vm6, nan, %v223_v24  ;;  %v380_v1 = vsel %vm214_vm6, nan, %v379_v63 }
  0x86   :  { %v381_v2 = vmul.f32 %v380_v1, %v69_v59  ;;  %v225_v3 = vmul.f32 %v224_v0, %v69_v59 }
  0x88   :  { %383 = vrot.lane.b32.xlu0 %v381_v2, %s515_s0 }
  0xb2   :  { %392 = vadd.xlane.f32.xlu0 %v391_v5 }
  0xfa   :  { %v384_v23 = vpop.permute.xlu0 %383 }
  0xfb   :  { %v387_v6 = vsel %vm386_vm8, %v225_v3, %v384_v23 }
  0xfc   :  { %v394_v7 = vmul.f32 %v387_v6, %v387_v6 }
  0xfe   :  { %v395_v57 = vsel %vm390_vm7, %v394_v7, 0.0 }
  0xff   :  { %396 = vadd.xlane.f32.xlu1 %v395_v57 }
 0x118   :  { %425 = vperm.xlu1 %471, %v388_v8  }
 0x125   :  { %v393_v9 = vpop.xlane.xlu0 %392 }
 0x126   :  { %478 = vrsqrt.f32 %v393_v9  ;;  %vm406_vm9 = vcmp.eq.f32.partialorder %v393_v9, inf  ;;  %v409_v22 = vand.u32 2147483648, %v393_v9  ;;  %vm408_vm10 = vcmp.eq.f32.partialorder %v393_v9, 0.0 }
 0x12c   :  { %v479_v11 = vpop.eup %478 }
 0x12d   :  { %v400_v12 = vmul.f32 %v479_v11, %v393_v9 }
 0x12f   :  { %v401_v13 = vmul.f32 %v479_v11, %v400_v12 }
 0x131   :  { %v402_v14 = vmul.f32 0.5, %v401_v13 }
 0x133   :  { %v403_v16 = vsub.f32 1.5, %v402_v14 }
 0x135   :  { %v404_v18 = vmul.f32 %v479_v11, %v403_v16 }
 0x137   :  { %v405_v20 = vmul.f32 %v404_v18, %v393_v9 }
 0x139   :  { %v407_v26 = vsel %vm406_vm9, %v393_v9, %v405_v20 }
 0x13a   :  { %v410_v28 = vsel %vm408_vm10, %v409_v22, %v407_v26 }
 0x13b   :  { %v411_v32 = vmul.f32 %v410_v28, %v388_v8 }
 0x172   :  { %v397_v15 = vpop.xlane.xlu1 %396 }
 0x173   :  { %v398_v17 = vmax.f32 %v397_v15, 1e-30 }
 0x175   :  { %480 = vrsqrt.f32 %v398_v17  ;;  %vm418_vm12 = vweird.f32 %v398_v17 }
 0x17b   :  { %v481_v19 = vpop.eup %480 }
 0x17c   :  { %v413_v21 = vmul.f32 %v481_v19, %v398_v17  ;;  %vm419_vm11 = vweird.f32 %v481_v19 }
 0x17d   :  { %vm420_vm13 = vmor %vm418_vm12, %vm419_vm11 }
 0x17e   :  { %v414_v25 = vmul.f32 %v481_v19, %v413_v21 }
 0x180   :  { %v415_v27 = vmul.f32 0.5, %v414_v25 }
 0x182   :  { %v416_v30 = vsub.f32 1.5, %v415_v27 }
 0x184   :  { %v417_v31 = vmul.f32 %v481_v19, %v416_v30 }
 0x186   :  { %v421_v33 = vsel %vm420_vm13, %v481_v19, %v417_v31 }
 0x187   :  { %v422_v34 = vmul.f32 %v421_v33, %v411_v32 }
 0x189   :  { %431 = vperm.xlu2 %472, %v422_v34  }
 0x18a   :  { %v426_v35 = vpop.permute.xlu1 %425 }
 0x18b   :  { %v428_v36 = vmul.f32 %v426_v35, %v16_v38 }
 0x1e3   :  { %v432_v37 = vpop.permute.xlu2 %431 }
 0x1e4   :  { %v434_v39 = vmul.f32 %v432_v37, %v387_v6 }
 0x1e6   :  { %v435_v40 = vadd.f32 %v434_v39, %v428_v36 }
 0x1e8   :  { %436 = vst.msk [vmem:[#allocation4] sm:$0xff] %vm390_vm7, %v435_v40 }
 0x1e9   :  { %447 = dma.vmem_to_hbm [thread:$0]  %s443_s2, 128, %s445_s20, [#allocation5]  }
 0x1ea   :  { %506 = dma.done.wait [#allocation5], 128  }
 0x1eb   :  { %507 = vsyncadd [#allocation5], 4294967168 }
 0x1ec   :  { %452 = vsyncpa [#allocation5], 1 }

</bundles_post_ra>
